<compile_context>
chip_gen: v7x
topology: tpu7x:2x2x1
jax: 0.10.0
libtpu: 0.0.40
codegen_flags: <defaults>
</compile_context>

<pallas_src>
import functools

import jax
import jax.numpy as jnp
from jax.experimental import pallas as pl
from jax.experimental.pallas import tpu as pltpu


def _round_up(x: int, m: int) -> int:
    return (x + m - 1) // m * m


def _tpu_generation_config():
    """Returns (parallel_cores, tile_budget_bytes, vmem_limit_bytes)."""
    kind = ""
    try:
        kind = jax.devices()[0].device_kind.lower()
    except Exception:
        pass
    is_v7 = ("v7" in kind) or ("7x" in kind)
    is_megacore = is_v7 or ("v4" in kind) or ("v5p" in kind)
    if is_v7:
        # 64 MiB VMEM per TensorCore: ~12 MiB/tile double-buffered stays <56 MiB.
        return 2, 12 * 1024 * 1024, 56 * 1024 * 1024
    # v5e / v6e (128 MiB physical VMEM); also the safe default for unknown HW.
    return (2 if is_megacore else 1), 16 * 1024 * 1024, 64 * 1024 * 1024


def _ce_kernel(anchors_ref, labels_ref, total_out_ref, count_out_ref,
               total_ref, count_ref, *, input_as_probabilities: bool):
    inner = pl.program_id(1)          # reduction axis (steps within one core)

    @pl.when(inner == 0)
    def _init():
        total_ref[...] = jnp.zeros_like(total_ref)
        count_ref[...] = jnp.zeros_like(count_ref)

    # Full f32 upcast: exact match with the f32 reference; this kernel is
    # DMA-bound so the cast rides in spare VALU slots.
    x = anchors_ref[...].astype(jnp.float32)        # (TILE_N, C)
    labels = labels_ref[...]                        # (TILE_N, 1) int32
    tn, c = x.shape

    # One-hot selection via iota compare (torch: one_hot[arange, labels] = 1),
    # kept boolean and consumed by jnp.where (no float one-hot temporary).
    class_ids = jax.lax.broadcasted_iota(jnp.int32, (tn, c), 1)
    sel = class_ids == labels                       # (TILE_N, C) bool
    valid = labels != -1                            # (TILE_N, 1) bool

    if input_as_probabilities:
        # anchors already hold probabilities: loss = -log(p[label]).
        # Select first, then log an (N,1) column -> N transcendentals, not N*C.
        p_label = jnp.sum(jnp.where(sel, x, 0.0), axis=1, keepdims=True)
        # Guard masked / padded rows so log never sees their (possibly 0) probs.
        per_row = -jnp.log(jnp.where(valid, p_label, 1.0))
    else:
        # logits: -log_softmax(x)[label] = lse(x - m) - (x - m)[label]
        m = jnp.max(x, axis=1, keepdims=True)
        z = x - m
        lse = jnp.log(jnp.sum(jnp.exp(z), axis=1, keepdims=True))
        z_label = jnp.sum(jnp.where(sel, z, 0.0), axis=1, keepdims=True)
        per_row = lse - z_label

    per_row = jnp.where(valid, per_row, 0.0)        # drop masked / padded rows
    total_ref[...] += jnp.sum(per_row, axis=(0, 1), keepdims=True)
    count_ref[...] += jnp.sum(valid.astype(jnp.float32), axis=(0, 1),
                              keepdims=True)

    @pl.when(inner == pl.num_programs(1) - 1)
    def _finalize():
        # Per-core partials; the wrapper does sum(total)/sum(count).
        total_out_ref[...] = total_ref[...].reshape(total_out_ref.shape)
        count_out_ref[...] = count_ref[...].reshape(count_out_ref.shape)


def custom_cross_entropy_loss(anchors: jnp.ndarray,
                              labels: jnp.ndarray,
                              input_as_probabilities: bool = False,
                              tile_n: int | None = None) -> jnp.ndarray:
    """anchors: [N, C] float (f32 or bf16), labels: [N] int (-1 drops a row)."""
    n, c = anchors.shape
    labels2d = labels.reshape(n, 1).astype(jnp.int32)

    p_cores, tile_budget, vmem_limit = _tpu_generation_config()
    itemsize = jnp.dtype(anchors.dtype).itemsize

    if tile_n is None:
        # Bytes-based sizing: ~12-16 MiB of anchors per grid step, no row cap.
        tile_n = tile_budget // max(1, c * itemsize)
    # Multiple of 16 covers f32 (8) and bf16 (16) sublane packing.
    tile_n = max(16, (int(tile_n) // 16) * 16)
    # Clamp only by the rows each core has to cover.
    rows_per_core = _round_up(-(-n // p_cores), 16)
    tile_n = min(tile_n, rows_per_core)

    steps = max(1, -(-n // (p_cores * tile_n)))     # reduction steps per core
    n_pad = p_cores * steps * tile_n
    if n_pad != n:
        anchors = jnp.pad(anchors, ((0, n_pad - n), (0, 0)))
        labels2d = jnp.pad(labels2d, ((0, n_pad - n), (0, 0)),
                           constant_values=-1)      # padded rows are masked out

    kernel = functools.partial(_ce_kernel,
                               input_as_probabilities=input_as_probabilities)

    totals, counts = pl.pallas_call(
        kernel,
        out_shape=(jax.ShapeDtypeStruct((p_cores, 1, 1), jnp.float32),
                   jax.ShapeDtypeStruct((p_cores, 1, 1), jnp.float32)),
        grid_spec=pltpu.PrefetchScalarGridSpec(
            num_scalar_prefetch=0,
            grid=(p_cores, steps),
            in_specs=[
                # anchors tile: row-block index = p * steps + i
                pl.BlockSpec((tile_n, c), lambda p, i: (p * steps + i, 0)),
                # labels tile
                pl.BlockSpec((tile_n, 1), lambda p, i: (p * steps + i, 0)),
            ],
            out_specs=[
                # per-core partial sums: resident across the reduction axis
                pl.BlockSpec((1, 1, 1), lambda p, i: (p, 0, 0)),
                pl.BlockSpec((1, 1, 1), lambda p, i: (p, 0, 0)),
            ],
            scratch_shapes=[
                pltpu.VMEM((1, 1), jnp.float32),   # running total (per core)
                pltpu.VMEM((1, 1), jnp.float32),   # running count (per core)
            ],
        ),
        compiler_params=pltpu.CompilerParams(
            dimension_semantics=("parallel", "arbitrary"),  # megacore + reduce
            vmem_limit_bytes=vmem_limit,
        ),
    )(anchors, labels2d)

    # Final reduce + divide in the wrapper (count == 0 -> nan, like torch.mean
    # of an empty tensor).
    return jnp.sum(totals) / jnp.sum(counts)


def _reference(anchors, labels, input_as_probabilities):
    # Pure-JAX reference mirroring the PyTorch forward.
    keep = labels != -1
    a = anchors.astype(jnp.float32)[keep]
    l = labels[keep]
    one_hot = jax.nn.one_hot(l, anchors.shape[1], dtype=jnp.float32)
    if input_as_probabilities:
        logp = jnp.log(a)
    else:
        logp = jax.nn.log_softmax(a, axis=1)
    return jnp.mean(jnp.sum(-(one_hot * logp), axis=1))


if __name__ == "__main__":
    num_classes = 32

    key = jax.random.PRNGKey(0)
    k_logits, k_labels, k_logits2, k_labels2, k_logits3, k_labels3 = (
        jax.random.split(key, 6))

    # ---- Small case (N=8, C=32), default tile sizing, both paths ----
    n = 8
    anchors = jax.random.normal(k_logits, (n, num_classes), dtype=jnp.float32)
    labels = jax.random.randint(k_labels, (n,), 0, num_classes, dtype=jnp.int32)
    labels = labels.at[1].set(-1).at[5].set(-1)     # drop some rows, like torch

    loss_logits = custom_cross_entropy_loss(anchors, labels,
                                            input_as_probabilities=False)
    jax.block_until_ready(loss_logits)

    probs = jax.nn.softmax(anchors, axis=1)
    loss_probs = custom_cross_entropy_loss(probs, labels,
                                           input_as_probabilities=True)
    jax.block_until_ready(loss_probs)

    assert jnp.allclose(loss_logits, _reference(anchors, labels, False), atol=1e-5)
    assert jnp.allclose(loss_probs, _reference(probs, labels, True), atol=1e-5)

    # ---- Multi-tile case (N=40, tile_n=16 -> several reduction steps) ----
    n2 = 40
    anchors2 = jax.random.normal(k_logits2, (n2, num_classes), dtype=jnp.float32)
    labels2 = jax.random.randint(k_labels2, (n2,), 0, num_classes, dtype=jnp.int32)
    labels2 = labels2.at[0].set(-1).at[17].set(-1).at[33].set(-1)

    loss_multi = custom_cross_entropy_loss(anchors2, labels2,
                                           input_as_probabilities=False,
                                           tile_n=16)
    jax.block_until_ready(loss_multi)
    assert jnp.allclose(loss_multi, _reference(anchors2, labels2, False), atol=1e-5)

    # bf16 ingestion (no wrapper cast; kernel up-casts internally).
    anchors2_bf16 = anchors2.astype(jnp.bfloat16)
    loss_bf16 = custom_cross_entropy_loss(anchors2_bf16, labels2,
                                          input_as_probabilities=False,
                                          tile_n=16)
    jax.block_until_ready(loss_bf16)
    assert jnp.allclose(loss_bf16, _reference(anchors2_bf16, labels2, False),
                        atol=1e-5)

    # ---- Mid-size case (N=300), default bytes-based tiling + padding ----
    n3 = 300
    anchors3 = jax.random.normal(k_logits3, (n3, num_classes), dtype=jnp.float32)
    labels3 = jax.random.randint(k_labels3, (n3,), 0, num_classes, dtype=jnp.int32)
    labels3 = labels3.at[7].set(-1).at[100].set(-1).at[299].set(-1)

    loss_mid = custom_cross_entropy_loss(anchors3, labels3,
                                         input_as_probabilities=False)
    jax.block_until_ready(loss_mid)
    assert jnp.allclose(loss_mid, _reference(anchors3, labels3, False), atol=1e-5)

    print("KERNEL_OK")
</pallas_src>

<mosaic_0001>
module attributes {stable_mosaic.version = 11 : i64} {
  func.func @_ce_kernel(%arg0: i32, %arg1: i32, %arg2: memref<16x32xf32, #tpu.memory_space<vmem>>, %arg3: memref<16x1xi32, #tpu.memory_space<vmem>>, %arg4: memref<1x1x1xf32, #tpu.memory_space<vmem>>, %arg5: memref<1x1x1xf32, #tpu.memory_space<vmem>>, %arg6: memref<1x1xf32, #tpu.memory_space<vmem>>, %arg7: memref<1x1xf32, #tpu.memory_space<vmem>>) attributes {dimension_semantics = [#tpu.dimension_semantics<parallel>, #tpu.dimension_semantics<arbitrary>], iteration_bounds = array<i64: 1, 1>, scalar_prefetch = 0 : i64, scratch_operands = 2 : i64, tpu.core_type = #tpu.core_type<tc>, window_params = [{transform_indices = @transform_0, window_bounds = array<i64: 16, 32>}, {transform_indices = @transform_1, window_bounds = array<i64: 16, 1>}, {transform_indices = @transform_2, window_bounds = array<i64: 1, 1, 1>}, {transform_indices = @transform_3, window_bounds = array<i64: 1, 1, 1>}]} {
    %c0_i32 = arith.constant 0 : i32
    %0 = arith.cmpi eq, %arg1, %c0_i32 : i32
    %1 = arith.extui %0 : i1 to i32
    %c0_i32_0 = arith.constant 0 : i32
    %2 = arith.cmpi ne, %1, %c0_i32_0 : i32
    scf.if %2 {
      %cst_20 = arith.constant 0.000000e+00 : f32
      %46 = vector.broadcast %cst_20 : f32 to vector<1x1xf32>
      %c0_21 = arith.constant 0 : index
      %c0_22 = arith.constant 0 : index
      %47 = vector.load %arg6[%c0_21, %c0_22] : memref<1x1xf32, #tpu.memory_space<vmem>>, vector<1x1xf32>
      tpu.vector_store %arg6[%c0_21, %c0_22], %46 {strides = array<i32>} : memref<1x1xf32, #tpu.memory_space<vmem>>, vector<1x1xf32>,
      %cst_23 = arith.constant 0.000000e+00 : f32
      %48 = vector.broadcast %cst_23 : f32 to vector<1x1xf32>
      %c0_24 = arith.constant 0 : index
      %c0_25 = arith.constant 0 : index
      %49 = vector.load %arg7[%c0_24, %c0_25] : memref<1x1xf32, #tpu.memory_space<vmem>>, vector<1x1xf32>
      tpu.vector_store %arg7[%c0_24, %c0_25], %48 {strides = array<i32>} : memref<1x1xf32, #tpu.memory_space<vmem>>, vector<1x1xf32>,
    } else {
    }
    %c0 = arith.constant 0 : index
    %c0_1 = arith.constant 0 : index
    %3 = vector.load %arg2[%c0, %c0_1] : memref<16x32xf32, #tpu.memory_space<vmem>>, vector<16x32xf32>
    %c0_2 = arith.constant 0 : index
    %c0_3 = arith.constant 0 : index
    %4 = vector.load %arg3[%c0_2, %c0_3] : memref<16x1xi32, #tpu.memory_space<vmem>>, vector<16x1xi32>
    %5 = tpu.iota {dimensions = array<i32: 1>} : vector<16x32xi32>
    %6 = vector.broadcast %4 : vector<16x1xi32> to vector<16x32xi32>
    %7 = arith.cmpi eq, %5, %6 : vector<16x32xi32>
    %c-1_i32 = arith.constant -1 : i32
    %8 = vector.broadcast %c-1_i32 : i32 to vector<16x1xi32>
    %9 = arith.cmpi ne, %4, %8 : vector<16x1xi32>
    %cst = arith.constant dense<0xFF800000> : vector<16xf32>
    %10 = vector.multi_reduction <maximumf>, %3, %cst [1] : vector<16x32xf32> to vector<16xf32>
    %11 = vector.shape_cast %10 : vector<16xf32> to vector<16x1xf32>
    %12 = vector.broadcast %11 : vector<16x1xf32> to vector<16x32xf32>
    %13 = arith.subf %3, %12 : vector<16x32xf32>
    %14 = math.exp %13 : vector<16x32xf32>
    %cst_4 = arith.constant dense<0.000000e+00> : vector<16xf32>
    %15 = vector.multi_reduction <add>, %14, %cst_4 [1] : vector<16x32xf32> to vector<16xf32>
    %16 = vector.shape_cast %15 : vector<16xf32> to vector<16x1xf32>
    %17 = math.log %16 : vector<16x1xf32>
    %cst_5 = arith.constant 0.000000e+00 : f32
    %18 = vector.broadcast %cst_5 : f32 to vector<16x32xf32>
    %19 = arith.select %7, %13, %18 : vector<16x32xi1>, vector<16x32xf32>
    %cst_6 = arith.constant dense<0.000000e+00> : vector<16xf32>
    %20 = vector.multi_reduction <add>, %19, %cst_6 [1] : vector<16x32xf32> to vector<16xf32>
    %21 = vector.shape_cast %20 : vector<16xf32> to vector<16x1xf32>
    %22 = arith.subf %17, %21 : vector<16x1xf32>
    %cst_7 = arith.constant 0.000000e+00 : f32
    %23 = vector.broadcast %cst_7 : f32 to vector<16x1xf32>
    %24 = arith.select %9, %22, %23 : vector<16x1xi1>, vector<16x1xf32>
    %c0_8 = arith.constant 0 : index
    %c0_9 = arith.constant 0 : index
    %25 = vector.load %arg6[%c0_8, %c0_9] : memref<1x1xf32, #tpu.memory_space<vmem>>, vector<1x1xf32>
    %26 = vector.shape_cast %24 : vector<16x1xf32> to vector<1x16x1xf32>
    %cst_10 = arith.constant dense<0.000000e+00> : vector<1xf32>
    %27 = vector.multi_reduction <add>, %26, %cst_10 [1, 2] : vector<1x16x1xf32> to vector<1xf32>
    %28 = vector.shape_cast %27 : vector<1xf32> to vector<1x1x1xf32>
    %29 = vector.extract %28[0, 0, 0] : f32 from vector<1x1x1xf32>
    %30 = vector.broadcast %29 : f32 to vector<1x1xf32>
    %31 = arith.addf %25, %30 : vector<1x1xf32>
    %c0_11 = arith.constant 0 : index
    %c0_12 = arith.constant 0 : index
    %32 = vector.load %arg6[%c0_11, %c0_12] : memref<1x1xf32, #tpu.memory_space<vmem>>, vector<1x1xf32>
    tpu.vector_store %arg6[%c0_11, %c0_12], %31 {strides = array<i32>} : memref<1x1xf32, #tpu.memory_space<vmem>>, vector<1x1xf32>,
    %c0_13 = arith.constant 0 : index
    %c0_14 = arith.constant 0 : index
    %33 = vector.load %arg7[%c0_13, %c0_14] : memref<1x1xf32, #tpu.memory_space<vmem>>, vector<1x1xf32>
    %34 = arith.extui %9 : vector<16x1xi1> to vector<16x1xi32>
    %35 = arith.sitofp %34 : vector<16x1xi32> to vector<16x1xf32>
    %36 = vector.shape_cast %35 : vector<16x1xf32> to vector<1x16x1xf32>
    %cst_15 = arith.constant dense<0.000000e+00> : vector<1xf32>
    %37 = vector.multi_reduction <add>, %36, %cst_15 [1, 2] : vector<1x16x1xf32> to vector<1xf32>
    %38 = vector.shape_cast %37 : vector<1xf32> to vector<1x1x1xf32>
    %39 = vector.extract %38[0, 0, 0] : f32 from vector<1x1x1xf32>
    %40 = vector.broadcast %39 : f32 to vector<1x1xf32>
    %41 = arith.addf %33, %40 : vector<1x1xf32>
    %c0_16 = arith.constant 0 : index
    %c0_17 = arith.constant 0 : index
    %42 = vector.load %arg7[%c0_16, %c0_17] : memref<1x1xf32, #tpu.memory_space<vmem>>, vector<1x1xf32>
    tpu.vector_store %arg7[%c0_16, %c0_17], %41 {strides = array<i32>} : memref<1x1xf32, #tpu.memory_space<vmem>>, vector<1x1xf32>,
    %c0_i32_18 = arith.constant 0 : i32
    %43 = arith.cmpi eq, %arg1, %c0_i32_18 : i32
    %44 = arith.extui %43 : i1 to i32
    %c0_i32_19 = arith.constant 0 : i32
    %45 = arith.cmpi ne, %44, %c0_i32_19 : i32
    scf.if %45 {
      %c0_20 = arith.constant 0 : index
      %c0_21 = arith.constant 0 : index
      %46 = vector.load %arg6[%c0_20, %c0_21] : memref<1x1xf32, #tpu.memory_space<vmem>>, vector<1x1xf32>
      %47 = vector.shape_cast %46 : vector<1x1xf32> to vector<1x1x1xf32>
      %c0_22 = arith.constant 0 : index
      %c0_23 = arith.constant 0 : index
      %c0_24 = arith.constant 0 : index
      %48 = vector.load %arg4[%c0_22, %c0_23, %c0_24] : memref<1x1x1xf32, #tpu.memory_space<vmem>>, vector<1x1x1xf32>
      tpu.vector_store %arg4[%c0_22, %c0_23, %c0_24], %47 {strides = array<i32>} : memref<1x1x1xf32, #tpu.memory_space<vmem>>, vector<1x1x1xf32>,
      %c0_25 = arith.constant 0 : index
      %c0_26 = arith.constant 0 : index
      %49 = vector.load %arg7[%c0_25, %c0_26] : memref<1x1xf32, #tpu.memory_space<vmem>>, vector<1x1xf32>
      %50 = vector.shape_cast %49 : vector<1x1xf32> to vector<1x1x1xf32>
      %c0_27 = arith.constant 0 : index
      %c0_28 = arith.constant 0 : index
      %c0_29 = arith.constant 0 : index
      %51 = vector.load %arg5[%c0_27, %c0_28, %c0_29] : memref<1x1x1xf32, #tpu.memory_space<vmem>>, vector<1x1x1xf32>
      tpu.vector_store %arg5[%c0_27, %c0_28, %c0_29], %50 {strides = array<i32>} : memref<1x1x1xf32, #tpu.memory_space<vmem>>, vector<1x1x1xf32>,
    } else {
    }
    return
  }
  func.func @transform_0(%arg0: i32, %arg1: i32) -> (i32, i32) {
    %c1_i32 = arith.constant 1 : i32
    %0 = arith.muli %arg0, %c1_i32 : i32
    %1 = arith.addi %0, %arg1 : i32
    %c0_i32 = arith.constant 0 : i32
    %c0_i32_0 = arith.constant 0 : i32
    return %1, %c0_i32 : i32, i32
  }
  func.func @transform_1(%arg0: i32, %arg1: i32) -> (i32, i32) {
    %c1_i32 = arith.constant 1 : i32
    %0 = arith.muli %arg0, %c1_i32 : i32
    %1 = arith.addi %0, %arg1 : i32
    %c0_i32 = arith.constant 0 : i32
    %c0_i32_0 = arith.constant 0 : i32
    return %1, %c0_i32 : i32, i32
  }
  func.func @transform_2(%arg0: i32, %arg1: i32) -> (i32, i32, i32) {
    %c0_i32 = arith.constant 0 : i32
    %c0_i32_0 = arith.constant 0 : i32
    %c0_i32_1 = arith.constant 0 : i32
    return %arg0, %c0_i32, %c0_i32_0 : i32, i32, i32
  }
  func.func @transform_3(%arg0: i32, %arg1: i32) -> (i32, i32, i32) {
    %c0_i32 = arith.constant 0 : i32
    %c0_i32_0 = arith.constant 0 : i32
    %c0_i32_1 = arith.constant 0 : i32
    return %arg0, %c0_i32, %c0_i32_0 : i32, i32, i32
  }
}

</mosaic_0001>

<bundles_post_ra>
// kernel: tpu_custom_call.1
= control target key start
LH: loop header
LB: loop body
LE: loop exit
PB: predicated region body
PF: predicated region fallthrough
CT: control target
= control target key end

     0   :  { %9 = vsyncpa [#allocation5], 0  ;;  %s404_s0 = inlined_call_operand.hbm [shape: f32[16,32], index: 0, kind: input, shape index: {}]   ;;  %s405_s1 = inlined_call_operand.hbm [shape: s32[16,1], index: 1, kind: input, shape index: {}]   ;;  %s406_s2 = inlined_call_operand.hbm [shape: f32[1,1,1], index: 2, kind: output, shape index: {0}]   ;;  %s407_s3 = inlined_call_operand.hbm [shape: f32[1,1,1], index: 3, kind: output, shape index: {1}]  }
   0x1   :  { %10 = vsyncpa [#allocation8], 0 }
   0x2   :  { %11 = vsyncpa [#allocation6], 0 }
   0x3   :  { %12 = vsyncpa [#allocation11], 0  ;;  %s308_s12 = smov [#allocation4]   ;;  %s212_s16 = scalar_lea.hbm %s404_s0, 256 }
   0x4   :  { %s22_s13 = sshll.u32 %s308_s12, 4  ;;  %p213_p0 = scmp.ne.s32.totalorder %s404_s0, %s212_s16  ;;  %s23_s13 = int_to_ptr.vmem [resolvable:$true] %s22_s13 }
   0x5   :  { %p216_p1 = scmp.lt.u32.totalorder %s212_s16, %s404_s0 }
   0x7   :  { %p218_p2 = pnand %p216_p1, %p213_p0 }
   0x9   :  { %221 = shalt.err (!%p218_p2)
}
   0xa   :  { %s222_s21 = scalar_lea.vmem %s23_s13, 256  ;;  %p227_p4 = scmp.lt.s32.totalorder %s23_s13, %s23_s13 }
   0xb   :  { %p223_p3 = scmp.ne.s32.totalorder %s23_s13, %s222_s21  ;;  %p228_p5 = scmp.lt.s32.totalorder %s222_s21, %s222_s21 }
   0xd   :  { %p229_p6 = por %p228_p5, %p227_p4 }
   0xf   :  { %p230_p7 = pnand %p229_p6, %p223_p3 }
  0x11   :  { %233 = shalt.err (!%p230_p7)
}
  0x12   :  { %s309_s22 = smov 128   ;;  %s310_s23 = smov 8  }
  0x13   :  { %28 = dma.hbm_to_vmem [thread:$0]  %s404_s0, 256, %s23_s13, [#allocation5], %s309_s22, %s309_s22, %s310_s23  }
  0x14   :  { %s311_s26 = smov [#allocation7]   ;;  %s234_s30 = scalar_lea.hbm %s405_s1, 256 }
  0x15   :  { %s38_s27 = sshll.u32 %s311_s26, 4  ;;  %p235_p8 = scmp.ne.s32.totalorder %s405_s1, %s234_s30  ;;  %s39_s27 = int_to_ptr.vmem [resolvable:$true] %s38_s27 }
  0x16   :  { %p238_p9 = scmp.lt.u32.totalorder %s234_s30, %s405_s1 }
  0x18   :  { %p240_p10 = pnand %p238_p9, %p235_p8 }
  0x1a   :  { %243 = shalt.err (!%p240_p10)
}
  0x1b   :  { %s244_s8 = scalar_lea.vmem %s39_s27, 256  ;;  %p249_p12 = scmp.lt.s32.totalorder %s39_s27, %s39_s27 }
  0x1c   :  { %p245_p11 = scmp.ne.s32.totalorder %s39_s27, %s244_s8  ;;  %p250_p13 = scmp.lt.s32.totalorder %s244_s8, %s244_s8 }
  0x1e   :  { %p251_p0 = por %p250_p13, %p249_p12 }
  0x20   :  { %p252_p1 = pnand %p251_p0, %p245_p11 }
  0x22   :  { %255 = shalt.err (!%p252_p1)
}
  0x23   :  { %44 = dma.hbm_to_vmem [thread:$0]  %s405_s1, 256, %s39_s27, [#allocation8], %s309_s22, %s309_s22, %s310_s23  }
  0x24   :  { %300 = dma.done.wait [#allocation5], 256  }
  0x25   :  { %301 = vsyncadd [#allocation5], 4294967040 }
  0x26   :  { %302 = dma.done.wait [#allocation8], 256  }
  0x27   :  { %303 = vsyncadd [#allocation8], 4294967040  ;;  %vm59_vm0 = vcmask 0   ;;  %v312_v0 = vmov 0   ;;  %v313_v1 = vmov 0.0   ;;  %vm78_vm1 = vcmask 261120  }
  0x28   :  { %202 = vset.pattern.permute.xlu1 %v312_v0  ;;  %60 = vst.msk [vmem:[#allocation2] sm:$0x1] %vm59_vm0, %v313_v1  ;;  %61 = vst.msk [vmem:[#allocation3] sm:$0x1] %vm59_vm0, %v313_v1  ;;  %203 = vset.pattern.permute.xlu0 %v312_v0  ;;  %v62_v2 = vld [vmem:[#allocation4] sm:$0xff]  ;;  %v63_v3 = vld [vmem:[#allocation4 + $0x8] sm:$0xff]  ;;  %v66_v13 = vlaneseq }
  0x29   :  { %v64_v4 = vld [vmem:[#allocation7] sm:$0xff]  ;;  %v79_v5 = vsel %vm78_vm1, %v62_v2, -inf  ;;  %v65_v6 = vld [vmem:[#allocation7 + $0x8] sm:$0xff]  ;;  %v82_v7 = vsel %vm78_vm1, %v63_v3, -inf  ;;  %vm114_vm6 = vcmask 7168   ;;  %s314_s11 = smov [#allocation9]  }
  0x2a   :  { %69 = vperm.xlu1 %202, %v64_v4   ;;  %80 = vmax.xlane.f32.xlu0 %v79_v5  ;;  %v67_v16 = vand.u32 127, %v66_v13  ;;  %vm76_vm4 = vcmp.ne.s32.totalorder %v64_v4, 4294967295  ;;  %vm77_vm5 = vcmp.ne.s32.totalorder %v65_v6, 4294967295  ;;  %s164_s12 = sshll.u32 %s314_s11, 4  ;;  %s315_s13 = smov [#allocation10]   ;;  %s165_s12 = int_to_ptr.vmem [resolvable:$true] %s164_s12 }
  0x2b   :  { %v188_v26 = vsel %vm76_vm4, 1.0, %v313_v1  ;;  %v189_v27 = vsel %vm77_vm5, 1.0, %v313_v1  ;;  %s174_s14 = sshll.u32 %s315_s13, 4  ;;  %s256_s15 = scalar_lea.vmem %s165_s12, 16  ;;  %s175_s14 = int_to_ptr.vmem [resolvable:$true] %s174_s14 }
  0x2c   :  { %v136_v28 = vsel %vm114_vm6, %v188_v26, 0.0  ;;  %v137_v29 = vsel %vm114_vm6, %v189_v27, 0.0  ;;  %p257_p2 = scmp.ne.s32.totalorder %s165_s12, %s256_s15  ;;  %s260_s16 = scalar_lea.vmem %s165_s12, 32 }
  0x2d   :  { %v138_v30 = vadd.f32 %v137_v29, %v136_v28  ;;  %p261_p3 = scmp.lt.s32.totalorder %s165_s12, %s165_s12  ;;  %p262_p4 = scmp.lt.s32.totalorder %s260_s16, %s256_s15 }
  0x2e   :  { %72 = vperm.xlu1 %202, %v65_v6   ;;  %83 = vmax.xlane.f32.xlu0 %v82_v7 }
  0x2f   :  { %v113_v60 = vld [vmem:[#allocation2] sm:$0x1]  ;;  %v131_v63 = vld [vmem:[#allocation3] sm:$0x1]  ;;  %p263_p5 = por %p262_p4, %p261_p3 }
  0x31   :  { %p264_p6 = pnand %p263_p5, %p257_p2 }
  0xa9   :  { %v70_v15 = vpop.permute.xlu1 %69 }
  0xaa   :  { %vm74_vm2 = vcmp.eq.s32.totalorder %v67_v16, %v70_v15 }
  0xad   :  { %v73_v18 = vpop.permute.xlu1 %72 }
  0xae   :  { %vm75_vm3 = vcmp.eq.s32.totalorder %v67_v16, %v73_v18 }
  0xb7   :  { %v81_v8 = vpop.xlane.xlu0 %80 }
  0xb8   :  { %v85_v9 = vsub.f32 %v62_v2, %v81_v8 }
  0xba   :  { %v87_v10 = vmul.f32 1.442695, %v85_v9  ;;  %v101_v20 = vsel %vm74_vm2, %v85_v9, 0.0 }
  0xbb   :  { %v84_v11 = vpop.xlane.xlu0 %83  ;;  %v103_v22 = vsel %vm78_vm1, %v101_v20, 0.0 }
  0xbc   :  { %204 = vpow2.f32 %v87_v10  ;;  %v86_v12 = vsub.f32 %v63_v3, %v84_v11 }
  0xbe   :  { %v89_v14 = vmul.f32 1.442695, %v86_v12  ;;  %v102_v24 = vsel %vm75_vm3, %v86_v12, 0.0 }
  0xbf   :  { %v106_v25 = vsel %vm78_vm1, %v102_v24, 0.0 }
  0xc0   :  { %206 = vpow2.f32 %v89_v14 }
  0xc6   :  { %v205_v17 = vpop.eup %204 }
  0xc7   :  { %v91_v19 = vsel %vm78_vm1, %v205_v17, 0.0 }
  0xc8   :  { %92 = vadd.xlane.f32.xlu0 %v91_v19 }
  0xca   :  { %v207_v21 = vpop.eup %206 }
  0xcb   :  { %v94_v23 = vsel %vm78_vm1, %v207_v21, 0.0 }
  0xcc   :  { %104 = vadd.xlane.f32.xlu0 %v103_v22  ;;  %95 = vadd.xlane.f32.xlu1 %v94_v23 }
  0xd0   :  { %107 = vadd.xlane.f32.xlu0 %v106_v25 }
 0x155   :  { %v93_v31 = vpop.xlane.xlu0 %92 }
 0x156   :  { %208 = vlog2.f32 %v93_v31 }
 0x159   :  { %v96_v32 = vpop.xlane.xlu1 %95  ;;  %v105_v34 = vpop.xlane.xlu0 %104 }
 0x15a   :  { %210 = vlog2.f32 %v96_v32 }
 0x15d   :  { %v108_v39 = vpop.xlane.xlu0 %107 }
 0x160   :  { %v209_v33 = vpop.eup %208 }
 0x161   :  { %v98_v35 = vmul.f32 0.6931472, %v209_v33 }
 0x163   :  { %v109_v36 = vsub.f32 %v98_v35, %v105_v34 }
 0x164   :  { %v211_v37 = vpop.eup %210 }
 0x165   :  { %v100_v38 = vmul.f32 0.6931472, %v211_v37  ;;  %v111_v40 = vsel %vm76_vm4, %v109_v36, 0.0 }
 0x166   :  { %v115_v43 = vsel %vm114_vm6, %v111_v40, 0.0 }
 0x167   :  { %v110_v41 = vsub.f32 %v100_v38, %v108_v39 }
 0x169   :  { %v112_v42 = vsel %vm77_vm5, %v110_v41, 0.0 }
 0x16a   :  { %v116_v44 = vsel %vm114_vm6, %v112_v42, 0.0 }
 0x16b   :  { %v117_v45 = vadd.f32 %v116_v44, %v115_v43 }
 0x16d   :  { %118 = vadd.xlane.f32.xlu0 %v117_v45 }
 0x171   :  { %139 = vadd.xlane.f32.xlu0 %v138_v30 }
 0x1fa   :  { %v119_v46 = vpop.xlane.xlu0 %118 }
 0x1fb   :  { %v120_v47 = vrot.slane %v119_v46, 4 }
 0x1fd   :  { %v121_v48 = vadd.f32 %v120_v47, %v119_v46 }
 0x1fe   :  { %v140_v49 = vpop.xlane.xlu0 %139 }
 0x1ff   :  { %v122_v50 = vrot.slane %v121_v48, 2  ;;  %v141_v51 = vrot.slane %v140_v49, 4 }
 0x201   :  { %v142_v52 = vadd.f32 %v141_v51, %v140_v49  ;;  %v123_v53 = vadd.f32 %v122_v50, %v121_v48 }
 0x203   :  { %v143_v54 = vrot.slane %v142_v52, 2  ;;  %v124_v55 = vrot.slane %v123_v53, 1 }
 0x205   :  { %v144_v56 = vadd.f32 %v143_v54, %v142_v52  ;;  %v125_v57 = vadd.f32 %v124_v55, %v123_v53 }
 0x207   :  { %190 = vpush %v125_v57  ;;  %v145_v58 = vrot.slane %v144_v56, 1 }
 0x209   :  { %v146_v59 = vadd.f32 %v145_v58, %v144_v56 }
 0x20b   :  { %192 = vpush %v146_v59 }
 0x238   :  { %s191_s1 = spop %190 }
 0x239   :  { %v127_v61 = vstv %s191_s1 }
 0x23a   :  { %v128_v62 = vadd.f32 %v127_v61, %v113_v60 }
 0x23c   :  { %130 = vst.msk [vmem:[#allocation2] sm:$0x1] %vm59_vm0, %v128_v62  ;;  %s193_s10 = spop %192 }
 0x23d   :  { %v148_v0 = vstv %s193_s10 }
 0x23e   :  { %v149_v1 = vadd.f32 %v148_v0, %v131_v63 }
 0x240   :  { %150 = vst.msk [vmem:[#allocation3] sm:$0x1] %vm59_vm0, %v149_v1 }
 0x243   :  { %v154_v2 = vld [vmem:[#allocation2] sm:$0x1] }
 0x244   :  { %155 = vst.msk [vmem:[#allocation9] sm:$0x1] %vm59_vm0, %v154_v2 }
 0x245   :  { %267 = shalt.err (!%p264_p6)
}
 0x246   :  { %s268_s19 = scalar_lea.hbm %s406_s2, 16 }
 0x247   :  { %p269_p7 = scmp.ne.s32.totalorder %s406_s2, %s268_s19  ;;  %p272_p8 = scmp.lt.u32.totalorder %s268_s19, %s406_s2 }
 0x249   :  { %p274_p9 = pnand %p272_p8, %p269_p7 }
 0x24b   :  { %277 = shalt.err (!%p274_p9)
}
 0x24c   :  { %167 = dma.vmem_to_hbm [thread:$0]  %s165_s12, 16, %s406_s2, [#allocation6]   ;;  %v156_v3 = vld [vmem:[#allocation3] sm:$0x1] }
 0x24d   :  { %157 = vst.msk [vmem:[#allocation10] sm:$0x1] %vm59_vm0, %v156_v3  ;;  %s278_s26 = scalar_lea.vmem %s175_s14, 16  ;;  %s282_s27 = scalar_lea.vmem %s175_s14, 32 }
 0x24e   :  { %p279_p10 = scmp.ne.s32.totalorder %s175_s14, %s278_s26  ;;  %p283_p11 = scmp.lt.s32.totalorder %s175_s14, %s175_s14 }
 0x24f   :  { %p284_p12 = scmp.lt.s32.totalorder %s282_s27, %s278_s26 }
 0x251   :  { %p285_p13 = por %p284_p12, %p283_p11 }
 0x253   :  { %p286_p0 = pnand %p285_p13, %p279_p10 }
 0x255   :  { %289 = shalt.err (!%p286_p0)
}
 0x256   :  { %s290_s30 = scalar_lea.hbm %s407_s3, 16 }
 0x257   :  { %p291_p1 = scmp.ne.s32.totalorder %s407_s3, %s290_s30  ;;  %p294_p2 = scmp.lt.u32.totalorder %s290_s30, %s407_s3 }
 0x259   :  { %p296_p3 = pnand %p294_p2, %p291_p1 }
 0x25b   :  { %299 = shalt.err (!%p296_p3)
}
 0x25c   :  { %177 = dma.vmem_to_hbm [thread:$0]  %s175_s14, 16, %s407_s3, [#allocation11]  }
 0x25d   :  { %304 = dma.done.wait [#allocation6], 16  }
 0x25e   :  { %305 = vsyncadd [#allocation6], 4294967280 }
 0x25f   :  { %306 = dma.done.wait [#allocation11], 16  }
 0x260   :  { %307 = vsyncadd [#allocation11], 4294967280 }
 0x261   :  { %184 = vsyncpa [#allocation5], 1 }
 0x262   :  { %185 = vsyncpa [#allocation8], 1 }
 0x263   :  { %186 = vsyncpa [#allocation6], 1 }
 0x264   :  { %187 = vsyncpa [#allocation11], 1 }

</bundles_post_ra>
